<compile_context>
chip_gen: v5e
topology: v5e:2x2
jax: 0.10.0
libtpu: 0.0.40
codegen_flags: <defaults>
</compile_context>

<pallas_src>
import functools

import jax
import jax.numpy as jnp
from jax import lax
from jax.experimental import pallas as pl
from jax.experimental.pallas import tpu as pltpu

_BN_EPS = 1e-5
_LANE = 128
_F32_SUBLANE = 8
_BF16_SUBLANE = 16


def _bn_relu(h, gamma, beta, b_true, row_mask):
    """Training-mode BatchNorm1d (biased variance, eps=1e-5) + ReLU, FMA-folded.

    One-pass statistics (var = E[h^2] - mu^2).  Padded batch rows of `h` are
    exactly zero, so dividing the full-axis sums by the TRUE batch size gives
    exact statistics; padded rows are re-zeroed after the ReLU (the shift may be
    nonzero there) to keep the next layer's statistics exact.
    """
    inv_b = jnp.float32(1.0 / b_true)
    mu = jnp.sum(h, axis=0, keepdims=True) * inv_b
    ex2 = jnp.sum(h * h, axis=0, keepdims=True) * inv_b
    var = jnp.maximum(ex2 - mu * mu, 0.0)                      # guard rounding
    scale = gamma * lax.rsqrt(var + jnp.float32(_BN_EPS))      # rsqrt -> EUP
    shift = beta - mu * scale
    out = jnp.maximum(h * scale + shift, 0.0)                  # per-elem FMA + max
    if row_mask is not None:
        out = jnp.where(row_mask, out, 0.0)
    return out


def cat_domain_kernel(x_ref, w1_ref, bn_ref, b3_ref, w2_hbm, w3_hbm,
                      o_ref, w2_vmem, w3_vmem, sem, *, mxu_dtype, b_true):
    # Kick off w2 / w3 HBM->VMEM copies immediately: they overlap with the
    # layer-1 matmul + BN instead of being exposed before the kernel starts.
    w2_cp = pltpu.make_async_copy(w2_hbm, w2_vmem, sem.at[0])
    w3_cp = pltpu.make_async_copy(w3_hbm, w3_vmem, sem.at[1])
    w2_cp.start()
    w3_cp.start()

    x = x_ref[...]
    b_pad = x.shape[0]
    row_mask = None
    if b_pad != b_true:  # static
        row_mask = lax.broadcasted_iota(jnp.int32, (b_pad, 1), 0) < b_true

    # layer1 (bias dropped: cancelled by training-mode BN mean-subtract) + bn1 + relu1
    h = jnp.dot(x.astype(mxu_dtype), w1_ref[...],
                preferred_element_type=jnp.float32)
    h = _bn_relu(h, bn_ref[0:1, :], bn_ref[1:2, :], b_true, row_mask)

    # layer2 (bias dropped) + bn2 + relu2
    w2_cp.wait()
    h = jnp.dot(h.astype(mxu_dtype), w2_vmem[...],
                preferred_element_type=jnp.float32)
    h = _bn_relu(h, bn_ref[2:3, :], bn_ref[3:4, :], b_true, row_mask)

    # layer3 (logits, bias kept)
    w3_cp.wait()
    y = jnp.dot(h.astype(mxu_dtype), w3_vmem[...],
                preferred_element_type=jnp.float32) + b3_ref[...]
    o_ref[...] = y.astype(o_ref.dtype)


def _round_up(n, m):
    return ((n + m - 1) // m) * m


def _pad2(a, rows, cols):
    return jnp.pad(a, ((0, rows - a.shape[0]), (0, cols - a.shape[1])))


def _vmem_limit_bytes():
    """Generation-aware budget: 3/4 of physical VMEM (96 MiB v5e/v6e, 48 MiB v7x)."""
    try:
        cap = int(pltpu.get_tpu_info().vmem_capacity_bytes)
    except Exception:
        cap = 64 * 1024 * 1024  # conservative fallback (v7x physical per TC)
    return (cap * 3) // 4


def cat_domain_forward(x, params, *, use_bf16_mxu=False, out_dtype=jnp.float32):
    """x: (B, in_feature) f32.  params: dict of 2-D arrays (see layout comment)."""
    B, in_feature = x.shape
    hidden = params["w1"].shape[1]
    out_dim = params["w3"].shape[1]

    in_p, hid_p, out_p = (_round_up(d, _LANE) for d in (in_feature, hidden, out_dim))
    sublane = _BF16_SUBLANE if use_bf16_mxu else _F32_SUBLANE
    b_p = _round_up(B, sublane)

    # Zero-pad: feature axes to lane multiples (lane-dense vst), batch to the
    # sublane multiple (dense vregs).  BN stays exact (see _bn_relu docstring),
    # and the final slice undoes both paddings exactly.
    xp = _pad2(x, b_p, in_p)
    w1 = _pad2(params["w1"], in_p, hid_p)
    w2 = _pad2(params["w2"], hid_p, hid_p)
    w3 = _pad2(params["w3"], hid_p, out_p)
    b3 = _pad2(params["b3"], 1, out_p)
    # Packed BN slab: rows [g1; be1; g2; be2].  Zero padding on the lane axis is
    # what keeps padded hidden columns exactly 0 (scale = shift = 0 there).
    bn = jnp.concatenate([_pad2(params["g1"], 1, hid_p),
                          _pad2(params["be1"], 1, hid_p),
                          _pad2(params["g2"], 1, hid_p),
                          _pad2(params["be2"], 1, hid_p)], axis=0)

    mxu_dtype = jnp.bfloat16 if use_bf16_mxu else jnp.float32
    if use_bf16_mxu:
        # bf16 is MXU-native on v5e/v6e/v7x alike; halves weight DMA bytes.
        w1, w2, w3 = (w.astype(jnp.bfloat16) for w in (w1, w2, w3))

    vmem = pl.BlockSpec(memory_space=pltpu.MemorySpace.VMEM)
    hbm = pl.BlockSpec(memory_space=pl.ANY)   # stay in HBM; kernel DMAs manually

    y_pad = pl.pallas_call(
        functools.partial(cat_domain_kernel, mxu_dtype=mxu_dtype, b_true=B),
        out_shape=jax.ShapeDtypeStruct((b_p, out_p), out_dtype),
        in_specs=[vmem, vmem, vmem, vmem, hbm, hbm],
        out_specs=vmem,
        scratch_shapes=[
            pltpu.VMEM((hid_p, hid_p), mxu_dtype),   # w2 landing buffer
            pltpu.VMEM((hid_p, out_p), mxu_dtype),   # w3 landing buffer
            pltpu.SemaphoreType.DMA((2,)),
        ],
        compiler_params=pltpu.CompilerParams(vmem_limit_bytes=_vmem_limit_bytes()),
    )(xp, w1, bn, b3, w2, w3)
    return y_pad[:B, :out_dim]


def init_params(key, in_feature, hidden_size, out_dim):
    """Deterministic synthetic params mimicking PyTorch Linear init ranges."""
    ks = jax.random.split(key, 10)

    def lin(kw, kb, fan_in, fan_out):
        bound = 1.0 / jnp.sqrt(jnp.float32(fan_in))
        w = jax.random.uniform(kw, (fan_in, fan_out), jnp.float32, -bound, bound)
        b = jax.random.uniform(kb, (1, fan_out), jnp.float32, -bound, bound)
        return w, b

    w1, b1 = lin(ks[0], ks[1], in_feature, hidden_size)
    w2, b2 = lin(ks[2], ks[3], hidden_size, hidden_size)
    w3, b3 = lin(ks[4], ks[5], hidden_size, out_dim)

    # BN affine params: PyTorch inits gamma=1, beta=0; perturb slightly so the
    # fused scale/shift path is actually exercised by the test.
    g1 = 1.0 + 0.1 * jax.random.normal(ks[6], (1, hidden_size), jnp.float32)
    be1 = 0.1 * jax.random.normal(ks[7], (1, hidden_size), jnp.float32)
    g2 = 1.0 + 0.1 * jax.random.normal(ks[8], (1, hidden_size), jnp.float32)
    be2 = 0.1 * jax.random.normal(ks[9], (1, hidden_size), jnp.float32)

    return dict(w1=w1, b1=b1, g1=g1, be1=be1,
                w2=w2, b2=b2, g2=g2, be2=be2,
                w3=w3, b3=b3)


def reference_forward(x, p):
    """Pure-JAX reference faithful to the PyTorch module (biases included,
    training-mode BatchNorm with biased variance)."""
    eps = _BN_EPS

    def bn_relu(h, g, be):
        mu = jnp.mean(h, axis=0, keepdims=True)
        var = jnp.mean((h - mu) ** 2, axis=0, keepdims=True)
        return jnp.maximum((h - mu) / jnp.sqrt(var + eps) * g + be, 0.0)

    h = bn_relu(x @ p["w1"] + p["b1"], p["g1"], p["be1"])
    h = bn_relu(h @ p["w2"] + p["b2"], p["g2"], p["be2"])
    return h @ p["w3"] + p["b3"]


if __name__ == "__main__":
    # B=6 deliberately NOT a sublane multiple, to exercise the batch padding +
    # exact-BN masking path.
    B, in_feature, hidden_size, out_dim = 6, 32, 64, 4

    key = jax.random.PRNGKey(0)
    kx, kp = jax.random.split(key)
    x = jax.random.normal(kx, (B, in_feature), jnp.float32)
    params = init_params(kp, in_feature, hidden_size, out_dim)

    y_ref = reference_forward(x, params)

    # f32 MXU-operand path: tight comparison against the reference.
    y = jax.block_until_ready(cat_domain_forward(x, params))
    assert y.shape == (B, out_dim)
    assert jnp.allclose(y, y_ref, atol=1e-4, rtol=1e-4), \
        float(jnp.max(jnp.abs(y - y_ref)))

    # bf16 MXU-operand path (valid on v5e/v6e/v7x): coarse sanity comparison.
    y_bf = jax.block_until_ready(cat_domain_forward(x, params, use_bf16_mxu=True))
    assert y_bf.shape == (B, out_dim)
    assert jnp.allclose(y_bf, y_ref, atol=2e-1, rtol=1e-1), \
        float(jnp.max(jnp.abs(y_bf - y_ref)))

    print("KERNEL_OK")
</pallas_src>

<mosaic_0001>
module attributes {stable_mosaic.version = 11 : i64} {
  func.func @cat_domain_kernel(%arg0: memref<8x128xf32, #tpu.memory_space<vmem>>, %arg1: memref<128x128xf32, #tpu.memory_space<vmem>>, %arg2: memref<4x128xf32, #tpu.memory_space<vmem>>, %arg3: memref<1x128xf32, #tpu.memory_space<vmem>>, %arg4: memref<128x128xf32, #tpu.memory_space<any>>, %arg5: memref<128x128xf32, #tpu.memory_space<any>>, %arg6: memref<8x128xf32, #tpu.memory_space<vmem>>, %arg7: memref<128x128xf32, #tpu.memory_space<vmem>>, %arg8: memref<128x128xf32, #tpu.memory_space<vmem>>, %arg9: memref<2x!tpu.dma_semaphore, #tpu.memory_space<semaphore_mem>>) attributes {dimension_semantics = [], scalar_prefetch = 0 : i64, scratch_operands = 3 : i64, tpu.core_type = #tpu.core_type<tc>} {
    %c0_i32 = arith.constant 0 : i32
    %0 = tpu.memref_slice %arg9[%c0_i32] : memref<2x!tpu.dma_semaphore, #tpu.memory_space<semaphore_mem>> -> memref<1x!tpu.dma_semaphore, #tpu.memory_space<semaphore_mem>>
    %1 = tpu.memref_squeeze %0 : memref<1x!tpu.dma_semaphore, #tpu.memory_space<semaphore_mem>> -> memref<!tpu.dma_semaphore, #tpu.memory_space<semaphore_mem>>
    tpu.enqueue_dma source(%arg4 : memref<128x128xf32, #tpu.memory_space<any>>) target(%arg7 : memref<128x128xf32, #tpu.memory_space<vmem>>) target_semaphore(%1 : memref<!tpu.dma_semaphore, #tpu.memory_space<semaphore_mem>>)
    %c1_i32 = arith.constant 1 : i32
    %2 = tpu.memref_slice %arg9[%c1_i32] : memref<2x!tpu.dma_semaphore, #tpu.memory_space<semaphore_mem>> -> memref<1x!tpu.dma_semaphore, #tpu.memory_space<semaphore_mem>>
    %3 = tpu.memref_squeeze %2 : memref<1x!tpu.dma_semaphore, #tpu.memory_space<semaphore_mem>> -> memref<!tpu.dma_semaphore, #tpu.memory_space<semaphore_mem>>
    tpu.enqueue_dma source(%arg5 : memref<128x128xf32, #tpu.memory_space<any>>) target(%arg8 : memref<128x128xf32, #tpu.memory_space<vmem>>) target_semaphore(%3 : memref<!tpu.dma_semaphore, #tpu.memory_space<semaphore_mem>>)
    %c0 = arith.constant 0 : index
    %c0_0 = arith.constant 0 : index
    %4 = vector.load %arg0[%c0, %c0_0] : memref<8x128xf32, #tpu.memory_space<vmem>>, vector<8x128xf32>
    %5 = tpu.iota {dimensions = array<i32: 0>} : vector<8x1xi32>
    %c6_i32 = arith.constant 6 : i32
    %6 = vector.broadcast %c6_i32 : i32 to vector<8x1xi32>
    %7 = arith.cmpi slt, %5, %6 : vector<8x1xi32>
    %c0_1 = arith.constant 0 : index
    %c0_2 = arith.constant 0 : index
    %8 = vector.load %arg1[%c0_1, %c0_2] : memref<128x128xf32, #tpu.memory_space<vmem>>, vector<128x128xf32>
    %cst = arith.constant dense<0.000000e+00> : vector<8x128xf32>
    %9 = tpu.matmul %4, %8, %cst {dimension_numbers = #tpu.dot_dimension_numbers<[1], [0], [0], [1], [0, 0, 1, 1], [], []>} : vector<8x128xf32>, vector<128x128xf32>, vector<8x128xf32> -> vector<8x128xf32>
    %c0_3 = arith.constant 0 : index
    %c0_4 = arith.constant 0 : index
    %10 = vector.load %arg2[%c0_3, %c0_4] : memref<4x128xf32, #tpu.memory_space<vmem>>, vector<1x128xf32>
    %c1 = arith.constant 1 : index
    %c0_5 = arith.constant 0 : index
    %11 = vector.load %arg2[%c1, %c0_5] : memref<4x128xf32, #tpu.memory_space<vmem>>, vector<1x128xf32>
    %cst_6 = arith.constant dense<0.000000e+00> : vector<128xf32>
    %12 = vector.multi_reduction <add>, %9, %cst_6 [0] : vector<8x128xf32> to vector<128xf32>
    %13 = vector.shape_cast %12 : vector<128xf32> to vector<1x128xf32>
    %cst_7 = arith.constant 0.166666672 : f32
    %14 = vector.broadcast %cst_7 : f32 to vector<1x128xf32>
    %15 = arith.mulf %13, %14 : vector<1x128xf32>
    %16 = arith.mulf %9, %9 : vector<8x128xf32>
    %cst_8 = arith.constant dense<0.000000e+00> : vector<128xf32>
    %17 = vector.multi_reduction <add>, %16, %cst_8 [0] : vector<8x128xf32> to vector<128xf32>
    %18 = vector.shape_cast %17 : vector<128xf32> to vector<1x128xf32>
    %cst_9 = arith.constant 0.166666672 : f32
    %19 = vector.broadcast %cst_9 : f32 to vector<1x128xf32>
    %20 = arith.mulf %18, %19 : vector<1x128xf32>
    %21 = arith.mulf %15, %15 : vector<1x128xf32>
    %22 = arith.subf %20, %21 : vector<1x128xf32>
    %cst_10 = arith.constant 0.000000e+00 : f32
    %23 = vector.broadcast %cst_10 : f32 to vector<1x128xf32>
    %24 = arith.maximumf %22, %23 : vector<1x128xf32>
    %cst_11 = arith.constant 9.99999974E-6 : f32
    %25 = vector.broadcast %cst_11 : f32 to vector<1x128xf32>
    %26 = arith.addf %24, %25 : vector<1x128xf32>
    %27 = math.rsqrt %26 : vector<1x128xf32>
    %28 = arith.mulf %10, %27 : vector<1x128xf32>
    %29 = arith.mulf %15, %28 : vector<1x128xf32>
    %30 = arith.subf %11, %29 : vector<1x128xf32>
    %31 = vector.broadcast %28 : vector<1x128xf32> to vector<8x128xf32>
    %32 = arith.mulf %9, %31 : vector<8x128xf32>
    %33 = vector.broadcast %30 : vector<1x128xf32> to vector<8x128xf32>
    %34 = arith.addf %32, %33 : vector<8x128xf32>
    %cst_12 = arith.constant 0.000000e+00 : f32
    %35 = vector.broadcast %cst_12 : f32 to vector<8x128xf32>
    %36 = arith.maximumf %34, %35 : vector<8x128xf32>
    %cst_13 = arith.constant 0.000000e+00 : f32
    %37 = vector.shape_cast %7 : vector<8x1xi1> to vector<8x1xi1>
    %38 = vector.broadcast %37 : vector<8x1xi1> to vector<8x128xi1>
    %39 = vector.broadcast %cst_13 : f32 to vector<8x128xf32>
    %40 = arith.select %38, %36, %39 : vector<8x128xi1>, vector<8x128xf32>
    %c0_i32_14 = arith.constant 0 : i32
    %41 = tpu.memref_slice %arg9[%c0_i32_14] : memref<2x!tpu.dma_semaphore, #tpu.memory_space<semaphore_mem>> -> memref<1x!tpu.dma_semaphore, #tpu.memory_space<semaphore_mem>>
    %42 = tpu.memref_squeeze %41 : memref<1x!tpu.dma_semaphore, #tpu.memory_space<semaphore_mem>> -> memref<!tpu.dma_semaphore, #tpu.memory_space<semaphore_mem>>
    tpu.wait_dma2 semaphore(%42 : memref<!tpu.dma_semaphore, #tpu.memory_space<semaphore_mem>>) src(%arg4 : memref<128x128xf32, #tpu.memory_space<any>>) dst(%arg7 : memref<128x128xf32, #tpu.memory_space<vmem>>)
    %c0_15 = arith.constant 0 : index
    %c0_16 = arith.constant 0 : index
    %43 = vector.load %arg7[%c0_15, %c0_16] : memref<128x128xf32, #tpu.memory_space<vmem>>, vector<128x128xf32>
    %cst_17 = arith.constant dense<0.000000e+00> : vector<8x128xf32>
    %44 = tpu.matmul %40, %43, %cst_17 {dimension_numbers = #tpu.dot_dimension_numbers<[1], [0], [0], [1], [0, 0, 1, 1], [], []>} : vector<8x128xf32>, vector<128x128xf32>, vector<8x128xf32> -> vector<8x128xf32>
    %c2 = arith.constant 2 : index
    %c0_18 = arith.constant 0 : index
    %45 = vector.load %arg2[%c2, %c0_18] : memref<4x128xf32, #tpu.memory_space<vmem>>, vector<1x128xf32>
    %c3 = arith.constant 3 : index
    %c0_19 = arith.constant 0 : index
    %46 = vector.load %arg2[%c3, %c0_19] : memref<4x128xf32, #tpu.memory_space<vmem>>, vector<1x128xf32>
    %cst_20 = arith.constant dense<0.000000e+00> : vector<128xf32>
    %47 = vector.multi_reduction <add>, %44, %cst_20 [0] : vector<8x128xf32> to vector<128xf32>
    %48 = vector.shape_cast %47 : vector<128xf32> to vector<1x128xf32>
    %cst_21 = arith.constant 0.166666672 : f32
    %49 = vector.broadcast %cst_21 : f32 to vector<1x128xf32>
    %50 = arith.mulf %48, %49 : vector<1x128xf32>
    %51 = arith.mulf %44, %44 : vector<8x128xf32>
    %cst_22 = arith.constant dense<0.000000e+00> : vector<128xf32>
    %52 = vector.multi_reduction <add>, %51, %cst_22 [0] : vector<8x128xf32> to vector<128xf32>
    %53 = vector.shape_cast %52 : vector<128xf32> to vector<1x128xf32>
    %cst_23 = arith.constant 0.166666672 : f32
    %54 = vector.broadcast %cst_23 : f32 to vector<1x128xf32>
    %55 = arith.mulf %53, %54 : vector<1x128xf32>
    %56 = arith.mulf %50, %50 : vector<1x128xf32>
    %57 = arith.subf %55, %56 : vector<1x128xf32>
    %cst_24 = arith.constant 0.000000e+00 : f32
    %58 = vector.broadcast %cst_24 : f32 to vector<1x128xf32>
    %59 = arith.maximumf %57, %58 : vector<1x128xf32>
    %cst_25 = arith.constant 9.99999974E-6 : f32
    %60 = vector.broadcast %cst_25 : f32 to vector<1x128xf32>
    %61 = arith.addf %59, %60 : vector<1x128xf32>
    %62 = math.rsqrt %61 : vector<1x128xf32>
    %63 = arith.mulf %45, %62 : vector<1x128xf32>
    %64 = arith.mulf %50, %63 : vector<1x128xf32>
    %65 = arith.subf %46, %64 : vector<1x128xf32>
    %66 = vector.broadcast %63 : vector<1x128xf32> to vector<8x128xf32>
    %67 = arith.mulf %44, %66 : vector<8x128xf32>
    %68 = vector.broadcast %65 : vector<1x128xf32> to vector<8x128xf32>
    %69 = arith.addf %67, %68 : vector<8x128xf32>
    %cst_26 = arith.constant 0.000000e+00 : f32
    %70 = vector.broadcast %cst_26 : f32 to vector<8x128xf32>
    %71 = arith.maximumf %69, %70 : vector<8x128xf32>
    %cst_27 = arith.constant 0.000000e+00 : f32
    %72 = vector.shape_cast %7 : vector<8x1xi1> to vector<8x1xi1>
    %73 = vector.broadcast %72 : vector<8x1xi1> to vector<8x128xi1>
    %74 = vector.broadcast %cst_27 : f32 to vector<8x128xf32>
    %75 = arith.select %73, %71, %74 : vector<8x128xi1>, vector<8x128xf32>
    %c1_i32_28 = arith.constant 1 : i32
    %76 = tpu.memref_slice %arg9[%c1_i32_28] : memref<2x!tpu.dma_semaphore, #tpu.memory_space<semaphore_mem>> -> memref<1x!tpu.dma_semaphore, #tpu.memory_space<semaphore_mem>>
    %77 = tpu.memref_squeeze %76 : memref<1x!tpu.dma_semaphore, #tpu.memory_space<semaphore_mem>> -> memref<!tpu.dma_semaphore, #tpu.memory_space<semaphore_mem>>
    tpu.wait_dma2 semaphore(%77 : memref<!tpu.dma_semaphore, #tpu.memory_space<semaphore_mem>>) src(%arg5 : memref<128x128xf32, #tpu.memory_space<any>>) dst(%arg8 : memref<128x128xf32, #tpu.memory_space<vmem>>)
    %c0_29 = arith.constant 0 : index
    %c0_30 = arith.constant 0 : index
    %78 = vector.load %arg8[%c0_29, %c0_30] : memref<128x128xf32, #tpu.memory_space<vmem>>, vector<128x128xf32>
    %cst_31 = arith.constant dense<0.000000e+00> : vector<8x128xf32>
    %79 = tpu.matmul %75, %78, %cst_31 {dimension_numbers = #tpu.dot_dimension_numbers<[1], [0], [0], [1], [0, 0, 1, 1], [], []>} : vector<8x128xf32>, vector<128x128xf32>, vector<8x128xf32> -> vector<8x128xf32>
    %c0_32 = arith.constant 0 : index
    %c0_33 = arith.constant 0 : index
    %80 = vector.load %arg3[%c0_32, %c0_33] : memref<1x128xf32, #tpu.memory_space<vmem>>, vector<1x128xf32>
    %81 = vector.broadcast %80 : vector<1x128xf32> to vector<8x128xf32>
    %82 = arith.addf %79, %81 : vector<8x128xf32>
    %c0_34 = arith.constant 0 : index
    %c0_35 = arith.constant 0 : index
    %83 = vector.load %arg6[%c0_34, %c0_35] : memref<8x128xf32, #tpu.memory_space<vmem>>, vector<8x128xf32>
    tpu.vector_store %arg6[%c0_34, %c0_35], %82 {strides = array<i32>} : memref<8x128xf32, #tpu.memory_space<vmem>>, vector<8x128xf32>,
    return
  }
}

</mosaic_0001>

<bundles_post_ra>
// kernel: tpu_custom_call.1
= control target key start
LH: loop header
LB: loop body
LE: loop exit
PB: predicated region body
PF: predicated region fallthrough
CT: control target
= control target key end

     0   :  { %11 = vsyncpa [#allocation6], 0  ;;  %s567_s0 = inlined_call_operand.hbm [shape: f32[8,128], index: 0, kind: input, shape index: {}]   ;;  %s568_s1 = inlined_call_operand.hbm [shape: f32[128,128], index: 1, kind: input, shape index: {}]   ;;  %s569_s2 = inlined_call_operand.hbm [shape: f32[4,128], index: 2, kind: input, shape index: {}]   ;;  %s570_s3 = inlined_call_operand.vmem [shape: f32[1,128], index: 3, kind: input, shape index: {}]   ;;  %s571_s4 = inlined_call_operand.hbm [shape: f32[128,128], index: 4, kind: input, shape index: {}]   ;;  %s572_s5 = inlined_call_operand.hbm [shape: f32[128,128], index: 5, kind: input, shape index: {}]   ;;  %s573_s6 = inlined_call_operand.hbm [shape: f32[8,128], index: 6, kind: output, shape index: {}]  }
   0x1   :  { %12 = vsyncpa [#allocation9], 0  ;;  %s29_s23 = sshll.u32 %s568_s1, 4  ;;  %s30_s23 = int_to_ptr.hbm [resolvable:$true] %s29_s23 }
   0x2   :  { %13 = vsyncpa [#allocation7], 0  ;;  %s496_s24 = smov [#allocation8]   ;;  %s19_s28 = sshll.u32 %s567_s0, 4  ;;  %s20_s28 = int_to_ptr.hbm [resolvable:$true] %s19_s28 }
   0x3   :  { %s31_s25 = sshll.u32 %s496_s24, 4  ;;  %s497_s29 = smov 128   ;;  %s32_s25 = int_to_ptr.vmem [resolvable:$true] %s31_s25 }
   0x4   :  { %s498_s30 = smov 8   ;;  %s499_s7 = smov [#allocation5]  }
   0x5   :  { %37 = dma.hbm_to_vmem [thread:$0]  %s30_s23, 2048, %s32_s25, [#allocation9], %s497_s29, %s497_s29, %s498_s30  }
   0x6   :  { %s21_s8 = sshll.u32 %s499_s7, 4  ;;  %s43_s11 = sshll.u32 %s569_s2, 4  ;;  %s22_s8 = int_to_ptr.vmem [resolvable:$true] %s21_s8  ;;  %s44_s11 = int_to_ptr.hbm [resolvable:$true] %s43_s11 }
   0x7   :  { %24 = dma.hbm_to_vmem [thread:$0]  %s20_s28, 128, %s22_s8, [#allocation6]  }
   0x8   :  { %s500_s1 = smov [#allocation10]  }
   0x9   :  { %s45_s12 = sshll.u32 %s500_s1, 4  ;;  %s46_s12 = int_to_ptr.vmem [resolvable:$true] %s45_s12 }
   0xa   :  { %48 = dma.hbm_to_vmem [thread:$0]  %s44_s11, 64, %s46_s12, [#allocation9]  }
   0xb   :  { %486 = dma.done.wait [#allocation6], 128  }
   0xc   :  { %487 = vsyncadd [#allocation6], 4294967168 }
   0xd   :  { %488 = dma.done.wait [#allocation9], 2112  }
   0xe   :  { %489 = vsyncadd [#allocation9], 4294965184  ;;  %v91_v0 = vlaneseq  ;;  %v109_v2 = vld [vmem:[#allocation8 + $0x78] sm:$0xff]  ;;  %v108_v3 = vld [vmem:[#allocation8 + $0x70] sm:$0xff]  ;;  %s70_s13 = sshll.u32 %s571_s4, 4  ;;  %s501_s14 = smov [#allocation2]   ;;  %s71_s13 = int_to_ptr.hbm [resolvable:$true] %s70_s13 }
   0xf   :  { %110 = vmatpush.msra.mxu0 %v109_v2  ;;  %v107_v4 = vld [vmem:[#allocation8 + $0x68] sm:$0xff]  ;;  %v106_v5 = vld [vmem:[#allocation8 + $0x60] sm:$0xff]  ;;  %v105_v6 = vld [vmem:[#allocation8 + $0x58] sm:$0xff]  ;;  %s72_s15 = sshll.u32 %s501_s14, 4  ;;  %s84_s18 = sshll.u32 %s572_s5, 4  ;;  %s73_s15 = int_to_ptr.vmem [resolvable:$true] %s72_s15  ;;  %s85_s18 = int_to_ptr.hbm [resolvable:$true] %s84_s18 }
  0x10   :  { %v548_v1 = vshrl.u32 %v91_v0, 7  ;;  %v104_v7 = vld [vmem:[#allocation8 + $0x50] sm:$0xff]  ;;  %v103_v8 = vld [vmem:[#allocation8 + $0x48] sm:$0xff]  ;;  %v102_v9 = vld [vmem:[#allocation8 + $0x40] sm:$0xff]  ;;  %75 = dma.hbm_to_vmem [thread:$0]  %s71_s13, 2048, %s73_s15, [#allocation4] }
  0x11   :  { %111 = vmatpush.msra.mxu0 %v108_v3  ;;  %v101_v10 = vld [vmem:[#allocation8 + $0x38] sm:$0xff]  ;;  %v100_v11 = vld [vmem:[#allocation8 + $0x30] sm:$0xff]  ;;  %v99_v12 = vld [vmem:[#allocation8 + $0x28] sm:$0xff]  ;;  %s502_s19 = smov [#allocation3]  }
  0x12   :  { %vm93_vm0 = vcmp.lt.s32.totalorder %v548_v1, 6  ;;  %v98_v13 = vld [vmem:[#allocation8 + $0x20] sm:$0xff]  ;;  %v97_v14 = vld [vmem:[#allocation8 + $0x18] sm:$0xff]  ;;  %v96_v15 = vld [vmem:[#allocation8 + $0x10] sm:$0xff]  ;;  %s86_s20 = sshll.u32 %s502_s19, 4  ;;  %s87_s20 = int_to_ptr.vmem [resolvable:$true] %s86_s20 }
  0x13   :  { %112 = vmatpush.msra.mxu0 %v107_v4  ;;  %v95_v16 = vld [vmem:[#allocation8 + $0x8] sm:$0xff]  ;;  %v94_v17 = vld [vmem:[#allocation8] sm:$0xff]  ;;  %v90_v18 = vld [vmem:[#allocation5] sm:$0xff]  ;;  %89 = dma.hbm_to_vmem [thread:$0]  %s85_s18, 2048, %s87_s20, [#allocation4 + $0x1] }
  0x14   :  { %v130_v44 = vld [vmem:[#allocation10] sm:$0x1]  ;;  %v131_v48 = vld [vmem:[#allocation10 + $0x1] sm:$0x1] }
  0x15   :  { %113 = vmatpush.msra.mxu0 %v106_v5 }
  0x17   :  { %114 = vmatpush.msra.mxu0 %v105_v6 }
  0x19   :  { %115 = vmatpush.msra.mxu0 %v104_v7 }
  0x1b   :  { %116 = vmatpush.msra.mxu0 %v103_v8 }
  0x1d   :  { %117 = vmatpush.msra.mxu0 %v102_v9 }
  0x1f   :  { %118 = vmatpush.msra.mxu0 %v101_v10 }
  0x21   :  { %119 = vmatpush.msra.mxu0 %v100_v11 }
  0x23   :  { %120 = vmatpush.msra.mxu0 %v99_v12 }
  0x25   :  { %121 = vmatpush.msra.mxu0 %v98_v13 }
  0x27   :  { %122 = vmatpush.msra.mxu0 %v97_v14 }
  0x29   :  { %123 = vmatpush.msra.mxu0 %v96_v15 }
  0x2b   :  { %124 = vmatpush.msra.mxu0 %v95_v16 }
  0x2d   :  { %125 = vmatpush.msra.mxu0 %v94_v17 }
  0x2e   :  { %126 = vmatmul.f32.vlgmr.msra.gmra.mxu0 %v90_v18 }
  0xab   :  { %v127_v19 = vpop.f32.mrf.mxu0 }
  0xac   :  { %v132_v20 = vrot.slane %v127_v19, 4  ;;  %v139_v21 = vmul.f32 %v127_v19, %v127_v19 }
  0xae   :  { %v133_v22 = vadd.f32 %v132_v20, %v127_v19  ;;  %v140_v23 = vrot.slane %v139_v21, 4 }
  0xb0   :  { %v134_v24 = vrot.slane %v133_v22, 2  ;;  %v141_v25 = vadd.f32 %v140_v23, %v139_v21 }
  0xb2   :  { %v135_v26 = vadd.f32 %v134_v24, %v133_v22  ;;  %v142_v27 = vrot.slane %v141_v25, 2 }
  0xb4   :  { %v136_v28 = vrot.slane %v135_v26, 1  ;;  %v143_v29 = vadd.f32 %v142_v27, %v141_v25 }
  0xb6   :  { %v137_v30 = vadd.f32 %v136_v28, %v135_v26  ;;  %v144_v31 = vrot.slane %v143_v29, 1 }
  0xb8   :  { %v138_v32 = vmul.f32 0.16666667, %v137_v30  ;;  %v145_v33 = vadd.f32 %v144_v31, %v143_v29 }
  0xba   :  { %v146_v34 = vmul.f32 0.16666667, %v145_v33  ;;  %v147_v35 = vmul.f32 %v138_v32, %v138_v32 }
  0xbc   :  { %v148_v36 = vsub.f32 %v146_v34, %v147_v35 }
  0xbe   :  { %v149_v37 = vmax.f32 %v148_v36, 0.0 }
  0xc0   :  { %v150_v38 = vadd.f32 1e-05, %v149_v37 }
  0xc2   :  { %337 = vrsqrt.f32 %v150_v38  ;;  %vm157_vm2 = vweird.f32 %v150_v38 }
  0xc8   :  { %v338_v39 = vpop.eup %337 }
  0xc9   :  { %v152_v40 = vmul.f32 %v338_v39, %v150_v38  ;;  %vm158_vm1 = vweird.f32 %v338_v39 }
  0xca   :  { %vm159_vm3 = vmor %vm157_vm2, %vm158_vm1 }
  0xcb   :  { %v153_v41 = vmul.f32 %v338_v39, %v152_v40 }
  0xcd   :  { %v154_v42 = vmul.f32 0.5, %v153_v41 }
  0xcf   :  { %v155_v43 = vsub.f32 1.5, %v154_v42 }
  0xd1   :  { %v156_v45 = vmul.f32 %v338_v39, %v155_v43 }
  0xd3   :  { %v160_v46 = vsel %vm159_vm3, %v338_v39, %v156_v45 }
  0xd4   :  { %v161_v47 = vmul.f32 %v160_v46, %v130_v44 }
  0xd6   :  { %v162_v49 = vmul.f32 %v161_v47, %v138_v32  ;;  %v164_v50 = vperm.slane %v161_v47, 0 }
  0xd8   :  { %v163_v51 = vsub.f32 %v131_v48, %v162_v49  ;;  %v165_v52 = vmul.f32 %v164_v50, %v127_v19 }
  0xda   :  { %v166_v53 = vperm.slane %v163_v51, 0 }
  0xdc   :  { %v167_v54 = vadd.f32 %v166_v53, %v165_v52 }
  0xde   :  { %v168_v55 = vmax.f32 %v167_v54, 0.0 }
  0xdf   :  { %490 = dma.done.wait [#allocation4], 2048 }
  0xe0   :  { %491 = vsyncadd [#allocation4], 4294965248  ;;  %v190_v56 = vld [vmem:[#allocation2 + $0x78] sm:$0xff]  ;;  %v189_v57 = vld [vmem:[#allocation2 + $0x70] sm:$0xff] }
  0xe1   :  { %191 = vmatpush.msra.mxu1 %v190_v56  ;;  %v188_v58 = vld [vmem:[#allocation2 + $0x68] sm:$0xff]  ;;  %v187_v59 = vld [vmem:[#allocation2 + $0x60] sm:$0xff]  ;;  %v186_v60 = vld [vmem:[#allocation2 + $0x58] sm:$0xff] }
  0xe2   :  { %v185_v61 = vld [vmem:[#allocation2 + $0x50] sm:$0xff]  ;;  %v184_v62 = vld [vmem:[#allocation2 + $0x48] sm:$0xff]  ;;  %v183_v63 = vld [vmem:[#allocation2 + $0x40] sm:$0xff] }
  0xe3   :  { %192 = vmatpush.msra.mxu1 %v189_v57  ;;  %v182_v0 = vld [vmem:[#allocation2 + $0x38] sm:$0xff]  ;;  %v181_v2 = vld [vmem:[#allocation2 + $0x30] sm:$0xff]  ;;  %v180_v3 = vld [vmem:[#allocation2 + $0x28] sm:$0xff] }
  0xe4   :  { %v179_v4 = vld [vmem:[#allocation2 + $0x20] sm:$0xff]  ;;  %v178_v5 = vld [vmem:[#allocation2 + $0x18] sm:$0xff]  ;;  %v177_v6 = vld [vmem:[#allocation2 + $0x10] sm:$0xff] }
  0xe5   :  { %193 = vmatpush.msra.mxu1 %v188_v58  ;;  %v176_v7 = vld [vmem:[#allocation2 + $0x8] sm:$0xff]  ;;  %v175_v8 = vld [vmem:[#allocation2] sm:$0xff] }
  0xe6   :  { %v211_v34 = vld [vmem:[#allocation10 + $0x2] sm:$0x1]  ;;  %v212_v38 = vld [vmem:[#allocation10 + $0x3] sm:$0x1] }
  0xe7   :  { %194 = vmatpush.msra.mxu1 %v187_v59 }
  0xe9   :  { %195 = vmatpush.msra.mxu1 %v186_v60 }
  0xeb   :  { %196 = vmatpush.msra.mxu1 %v185_v61 }
  0xed   :  { %197 = vmatpush.msra.mxu1 %v184_v62 }
  0xef   :  { %198 = vmatpush.msra.mxu1 %v183_v63 }
  0xf1   :  { %199 = vmatpush.msra.mxu1 %v182_v0 }
  0xf3   :  { %200 = vmatpush.msra.mxu1 %v181_v2 }
  0xf5   :  { %201 = vmatpush.msra.mxu1 %v180_v3 }
  0xf7   :  { %202 = vmatpush.msra.mxu1 %v179_v4 }
  0xf9   :  { %203 = vmatpush.msra.mxu1 %v178_v5 }
  0xfb   :  { %204 = vmatpush.msra.mxu1 %v177_v6 }
  0xfd   :  { %205 = vmatpush.msra.mxu1 %v176_v7 }
  0xff   :  { %206 = vmatpush.msra.mxu1 %v175_v8 }
 0x100   :  { %325 = vmatmul.msk.f32.vlgmr.msra.gmra.mxu1 %vm93_vm0, %v168_v55 }
 0x17d   :  { %v208_v9 = vpop.f32.mrf.mxu1 }
 0x17e   :  { %v213_v10 = vrot.slane %v208_v9, 4  ;;  %v220_v11 = vmul.f32 %v208_v9, %v208_v9 }
 0x180   :  { %v214_v12 = vadd.f32 %v213_v10, %v208_v9  ;;  %v221_v13 = vrot.slane %v220_v11, 4 }
 0x182   :  { %v215_v14 = vrot.slane %v214_v12, 2  ;;  %v222_v15 = vadd.f32 %v221_v13, %v220_v11 }
 0x184   :  { %v216_v16 = vadd.f32 %v215_v14, %v214_v12  ;;  %v223_v17 = vrot.slane %v222_v15, 2 }
 0x186   :  { %v217_v18 = vrot.slane %v216_v16, 1  ;;  %v224_v19 = vadd.f32 %v223_v17, %v222_v15 }
 0x188   :  { %v218_v20 = vadd.f32 %v217_v18, %v216_v16  ;;  %v225_v21 = vrot.slane %v224_v19, 1 }
 0x18a   :  { %v219_v22 = vmul.f32 0.16666667, %v218_v20  ;;  %v226_v23 = vadd.f32 %v225_v21, %v224_v19 }
 0x18c   :  { %v227_v24 = vmul.f32 0.16666667, %v226_v23  ;;  %v228_v25 = vmul.f32 %v219_v22, %v219_v22 }
 0x18e   :  { %v229_v26 = vsub.f32 %v227_v24, %v228_v25 }
 0x190   :  { %v230_v27 = vmax.f32 %v229_v26, 0.0 }
 0x192   :  { %v231_v28 = vadd.f32 1e-05, %v230_v27 }
 0x194   :  { %339 = vrsqrt.f32 %v231_v28  ;;  %vm238_vm5 = vweird.f32 %v231_v28 }
 0x19a   :  { %v340_v29 = vpop.eup %339 }
 0x19b   :  { %v233_v30 = vmul.f32 %v340_v29, %v231_v28  ;;  %vm239_vm4 = vweird.f32 %v340_v29 }
 0x19c   :  { %vm240_vm6 = vmor %vm238_vm5, %vm239_vm4 }
 0x19d   :  { %v234_v31 = vmul.f32 %v340_v29, %v233_v30 }
 0x19f   :  { %v235_v32 = vmul.f32 0.5, %v234_v31 }
 0x1a1   :  { %v236_v33 = vsub.f32 1.5, %v235_v32 }
 0x1a3   :  { %v237_v35 = vmul.f32 %v340_v29, %v236_v33 }
 0x1a5   :  { %v241_v36 = vsel %vm240_vm6, %v340_v29, %v237_v35 }
 0x1a6   :  { %v242_v37 = vmul.f32 %v241_v36, %v211_v34 }
 0x1a8   :  { %v243_v39 = vmul.f32 %v242_v37, %v219_v22  ;;  %v245_v40 = vperm.slane %v242_v37, 0 }
 0x1aa   :  { %v244_v41 = vsub.f32 %v212_v38, %v243_v39  ;;  %v246_v42 = vmul.f32 %v245_v40, %v208_v9 }
 0x1ac   :  { %v247_v43 = vperm.slane %v244_v41, 0 }
 0x1ae   :  { %v248_v44 = vadd.f32 %v247_v43, %v246_v42 }
 0x1b0   :  { %v249_v45 = vmax.f32 %v248_v44, 0.0 }
 0x1b1   :  { %492 = dma.done.wait [#allocation4 + $0x1], 2048 }
 0x1b2   :  { %493 = vsyncadd [#allocation4 + $0x1], 4294965248  ;;  %v268_v46 = vld [vmem:[#allocation3 + $0x78] sm:$0xff]  ;;  %v267_v47 = vld [vmem:[#allocation3 + $0x70] sm:$0xff]  ;;  %s503_s21 = smov [#allocation11]   ;;  %s301_s25 = sshll.u32 %s573_s6, 4  ;;  %s302_s25 = int_to_ptr.hbm [resolvable:$true] %s301_s25 }
 0x1b3   :  { %273 = vmatpush.msra.mxu2 %v268_v46  ;;  %v266_v48 = vld [vmem:[#allocation3 + $0x68] sm:$0xff]  ;;  %v265_v49 = vld [vmem:[#allocation3 + $0x60] sm:$0xff]  ;;  %v264_v50 = vld [vmem:[#allocation3 + $0x58] sm:$0xff]  ;;  %s299_s22 = sshll.u32 %s503_s21, 4  ;;  %s300_s22 = int_to_ptr.vmem [resolvable:$true] %s299_s22 }
 0x1b4   :  { %v263_v51 = vld [vmem:[#allocation3 + $0x50] sm:$0xff]  ;;  %v262_v52 = vld [vmem:[#allocation3 + $0x48] sm:$0xff]  ;;  %v261_v53 = vld [vmem:[#allocation3 + $0x40] sm:$0xff] }
 0x1b5   :  { %274 = vmatpush.msra.mxu2 %v267_v47  ;;  %v260_v54 = vld [vmem:[#allocation3 + $0x38] sm:$0xff]  ;;  %v259_v55 = vld [vmem:[#allocation3 + $0x30] sm:$0xff]  ;;  %v258_v56 = vld [vmem:[#allocation3 + $0x28] sm:$0xff] }
 0x1b6   :  { %v257_v57 = vld [vmem:[#allocation3 + $0x20] sm:$0xff]  ;;  %v256_v58 = vld [vmem:[#allocation3 + $0x18] sm:$0xff]  ;;  %v255_v59 = vld [vmem:[#allocation3 + $0x10] sm:$0xff] }
 0x1b7   :  { %275 = vmatpush.msra.mxu2 %v266_v48  ;;  %v254_v60 = vld [vmem:[#allocation3 + $0x8] sm:$0xff]  ;;  %v253_v61 = vld [vmem:[#allocation3] sm:$0xff] }
 0x1b8   :  { %v341_v62 = vld [vmem:[%s570_s3] ss:$0 sm:$0xff] }
 0x1b9   :  { %276 = vmatpush.msra.mxu2 %v265_v49 }
 0x1bb   :  { %277 = vmatpush.msra.mxu2 %v264_v50 }
 0x1bd   :  { %278 = vmatpush.msra.mxu2 %v263_v51 }
 0x1bf   :  { %279 = vmatpush.msra.mxu2 %v262_v52 }
 0x1c1   :  { %280 = vmatpush.msra.mxu2 %v261_v53 }
 0x1c3   :  { %281 = vmatpush.msra.mxu2 %v260_v54 }
 0x1c5   :  { %282 = vmatpush.msra.mxu2 %v259_v55 }
 0x1c7   :  { %283 = vmatpush.msra.mxu2 %v258_v56 }
 0x1c9   :  { %284 = vmatpush.msra.mxu2 %v257_v57 }
 0x1cb   :  { %285 = vmatpush.msra.mxu2 %v256_v58 }
 0x1cd   :  { %286 = vmatpush.msra.mxu2 %v255_v59 }
 0x1cf   :  { %287 = vmatpush.msra.mxu2 %v254_v60 }
 0x1d1   :  { %288 = vmatpush.msra.mxu2 %v253_v61 }
 0x1d2   :  { %326 = vmatmul.msk.f32.vlgmr.msra.gmra.mxu2 %vm93_vm0, %v249_v45 }
 0x255   :  { %v290_v63 = vpop.f32.mrf.mxu2 }
 0x256   :  { %v291_v0 = vadd.f32 %v341_v62, %v290_v63 }
 0x258   :  { %293 = vst [vmem:[#allocation11] sm:$0xff] %v291_v0 }
 0x259   :  { %304 = dma.vmem_to_hbm [thread:$0]  %s300_s22, 128, %s302_s25, [#allocation7]  }
 0x25a   :  { %494 = dma.done.wait [#allocation7], 128  }
 0x25b   :  { %495 = vsyncadd [#allocation7], 4294967168 }
 0x25c   :  { %309 = vsyncpa [#allocation6], 1 }
 0x25d   :  { %310 = vsyncpa [#allocation9], 1 }
 0x25e   :  { %311 = vsyncpa [#allocation7], 1 }
 0x25f   :  { %312 = vsyncmov [#allocation4] }
 0x262   :  { %s313_s26 = vpop.sfrf %312 }
 0x263   :  { %p327_p0 = scmp.ne.s32.totalorder %s313_s26, 0 }
 0x265   :  { %317 = shalt.err (%p327_p0)  }
 0x266   :  { %319 = vsyncmov [#allocation4 + $0x1] }
 0x269   :  { %s320_s3 = vpop.sfrf %319 }
 0x26a   :  { %p328_p1 = scmp.ne.s32.totalorder %s320_s3, 0 }
 0x26c   :  { %324 = shalt.err (%p328_p1)  }

</bundles_post_ra>
